<compile_context>
chip_gen: v5e
topology: v5e:2x2
jax: 0.10.0
libtpu: 0.0.40
codegen_flags: <defaults>
</compile_context>

<pallas_src>
import jax
import jax.numpy as jnp
from jax.experimental import pallas as pl
from jax.experimental.pallas import tpu as pltpu

LABEL_SMOOTHING = 0.1
IGNORE_INDEX = -1
NUM_SHARDS = 2            # leading grid axis; sharded across TCs on v7x megacore
_NEG_PAD = -1e9           # logit value for padded vocab columns (exp() -> 0)


def _vmem_capacity_bytes():
    try:
        return int(pltpu.get_tpu_info().vmem_capacity_bytes)
    except Exception:
        return 64 * 1024 * 1024   # conservative (v7x per-TC)


def _make_kernel(n_rows, tm, steps, v_true, v_block):
    """Label-smoothed CE per tile; accumulates per-row partials in the
    resident output blocks across the inner (reduction) grid axis."""
    eps = float(LABEL_SMOOTHING)
    w_tgt = (1.0 - eps) + eps / v_true
    w_off = eps / v_true

    def kernel(tgt_ref, logits_ref, loss_ref, cnt_ref):
        c = pl.program_id(0)
        i = pl.program_id(1)

        @pl.when(i == 0)
        def _():
            loss_ref[...] = jnp.zeros_like(loss_ref)
            cnt_ref[...] = jnp.zeros_like(cnt_ref)

        x = logits_ref[...].astype(jnp.float32)            # (tm, Vb)
        tgt = tgt_ref[...]                                 # (tm, 1) int32

        # Row validity: logical (unclamped) block index * tm + row < n_rows.
        # Out-of-range rows (ragged tail / clamped duplicate blocks) hold
        # garbage logits/targets and must contribute exactly zero.
        row_start = (c * steps + i) * tm
        rows = row_start + jax.lax.broadcasted_iota(jnp.int32, (tm, 1), 0)
        valid = jnp.logical_and(rows < n_rows, tgt >= 0)

        # Numerically-stable logsumexp (no logp materialization).
        m = jnp.max(x, axis=-1, keepdims=True)
        lse = jnp.log(jnp.sum(jnp.exp(x - m), axis=-1, keepdims=True)) + m

        # Single fused weighted lane reduction replaces tgt_x + sum_x passes.
        cols = jax.lax.broadcasted_iota(jnp.int32, x.shape, 1)
        w = jnp.where(cols == tgt, jnp.float32(w_tgt), jnp.float32(w_off))
        if v_block != v_true:            # static branch: padded vocab columns
            w = jnp.where(cols < v_true, w, jnp.float32(0.0))
        smoothed = jnp.sum(w * x, axis=-1, keepdims=True)

        nll = lse - smoothed
        # where() not multiply: garbage rows may carry Inf/NaN.
        loss_ref[...] += jnp.where(valid, nll, jnp.float32(0.0))
        cnt_ref[...] += valid.astype(jnp.float32)

    return kernel


def _choose_tm(n, v_block, budget_bytes, max_tm):
    """Largest multiple-of-8 row tile whose (tm, V) f32 block fits the
    per-tile budget, and no larger than one shard's worth of rows."""
    bytes_per_row = max(v_block * 4, 1)
    budget_rows = max(8, budget_bytes // bytes_per_row)
    tm = min(max_tm, budget_rows)
    rows_per_shard = -(-n // NUM_SHARDS)              # ceil
    tm = min(tm, -(-rows_per_shard // 8) * 8)
    return max(8, (tm // 8) * 8)


def _criterion_pallas(logits_2d, targets_2d):
    n, v_true = logits_2d.shape
    v_block = v_true
    # Tiny vocab: pad once to a full 128-lane block (cheap; restores lane
    # utilization).  Big non-multiple-of-128 vocabs keep the full-dim block
    # (only the final vreg is partially used) — no extra HBM copy.
    if v_true < 128:
        logits_2d = jnp.pad(logits_2d, ((0, 0), (0, 128 - v_true)),
                            constant_values=_NEG_PAD)
        v_block = 128

    vmem_cap = _vmem_capacity_bytes()
    if vmem_cap >= 96 * 1024 * 1024:      # v5e / v6e: 128 MiB VMEM
        budget, max_tm = 16 * 1024 * 1024, 2048
    else:                                 # v7x: 64 MiB VMEM per TC
        budget, max_tm = 4 * 1024 * 1024, 512
    tm = _choose_tm(n, v_block, budget, max_tm)

    total_blocks = -(-n // tm)                        # ceil — NO row padding
    steps = -(-total_blocks // NUM_SHARDS)            # inner (reduction) steps
    last_block = total_blocks - 1

    # double-buffered input tile + f32 intermediates + headroom
    in_bytes = 2 * tm * v_block * logits_2d.dtype.itemsize
    vmem_bytes = in_bytes + 4 * tm * v_block * 4 + (4 << 20)
    vmem_bytes = int(max(16 << 20,
                         min(vmem_bytes, max(vmem_cap - (12 << 20), 16 << 20))))

    kernel = _make_kernel(n, tm, steps, v_true, v_block)

    # Clamp logical block index so trailing (fully out-of-range) grid slots
    # re-read the last real block; the kernel masks them to zero.
    def row_map(c, i):
        return (jnp.minimum(c * steps + i, last_block), 0)

    partial_loss, partial_cnt = pl.pallas_call(
        kernel,
        out_shape=(
            jax.ShapeDtypeStruct((NUM_SHARDS * tm, 1), jnp.float32),
            jax.ShapeDtypeStruct((NUM_SHARDS * tm, 1), jnp.float32),
        ),
        grid_spec=pltpu.PrefetchScalarGridSpec(
            num_scalar_prefetch=0,
            grid=(NUM_SHARDS, steps),
            in_specs=[
                pl.BlockSpec((tm, 1), row_map),
                pl.BlockSpec((tm, v_block), row_map),
            ],
            out_specs=[
                pl.BlockSpec((tm, 1), lambda c, i: (c, 0)),
                pl.BlockSpec((tm, 1), lambda c, i: (c, 0)),
            ],
        ),
        compiler_params=pltpu.CompilerParams(
            # TODO(synk): on v7x, verify this "parallel" axis actually shards
            # across both TensorCores (else switch to pltpu.CORE_PARALLEL).
            dimension_semantics=("parallel", "arbitrary"),
            vmem_limit_bytes=vmem_bytes,
        ),
    )(targets_2d, logits_2d)

    return jnp.sum(partial_loss), jnp.sum(partial_cnt)


class CriterionFace:
    """JAX analogue of TH_CriterionFace wrapping a label-smoothed CE criterion."""

    def __init__(self, amp=False):
        self.amp = amp

    def _train_forward(self, logits, targets):
        b, t, v = logits.shape
        logits_2d = logits.reshape(b * t, v)          # dtype passed through
        targets_2d = targets.reshape(b * t, 1).astype(jnp.int32)
        loss_sum, count = _criterion_pallas(logits_2d, targets_2d)
        loss = loss_sum / jnp.maximum(count, 1.0)
        # count is f32 (torch returns an int token count; benign difference).
        return loss, count

    def __call__(self, logits, targets, valid=False):
        if valid:
            return self.valid_forward(logits, targets)
        # amp: no wrapper-side cast (it would be an extra HBM pass); the kernel
        # accepts bf16 logits directly and upcasts per tile — callers under
        # mixed precision should simply feed bf16 logits.
        return self._train_forward(logits, targets)

    def valid_forward(self, logits, targets):
        # torch.no_grad() analogue
        logits = jax.lax.stop_gradient(logits)
        targets = jax.lax.stop_gradient(targets)
        return self._train_forward(logits, targets)


def _reference(logits, targets):
    b, t, v = logits.shape
    lp = jax.nn.log_softmax(logits.astype(jnp.float32), axis=-1)
    tflat = targets.reshape(-1)
    lpflat = lp.reshape(-1, v)
    mask = (tflat >= 0).astype(jnp.float32)
    safe_t = jnp.where(tflat >= 0, tflat, 0)
    tgt_lp = jnp.take_along_axis(lpflat, safe_t[:, None], axis=-1)[:, 0]
    smooth = jnp.mean(lpflat, axis=-1)
    nll = -((1.0 - LABEL_SMOOTHING) * tgt_lp + LABEL_SMOOTHING * smooth) * mask
    return nll.sum() / jnp.maximum(mask.sum(), 1.0), mask.sum()


if __name__ == "__main__":
    key = jax.random.PRNGKey(0)
    crit = CriterionFace(amp=False)

    # Case 1: f32, divisible row count, some ignored (padding) positions.
    k1, k2 = jax.random.split(key)
    B, T, V = 2, 8, 32
    logits = jax.random.normal(k1, (B, T, V), dtype=jnp.float32)
    targets = jax.random.randint(k2, (B, T), 0, V, dtype=jnp.int32)
    targets = targets.at[:, -2:].set(IGNORE_INDEX)

    loss, count = crit(logits, targets, valid=False)
    loss = jax.block_until_ready(loss)
    count = jax.block_until_ready(count)
    vloss, vcount = crit(logits, targets, valid=True)
    jax.block_until_ready(vloss)

    ref_loss, ref_cnt = _reference(logits, targets)
    assert jnp.allclose(loss, ref_loss, atol=1e-5), (loss, ref_loss)
    assert jnp.allclose(count, ref_cnt), (count, ref_cnt)
    assert jnp.allclose(vloss, ref_loss, atol=1e-5)

    # Case 2: ragged row count (exercises in-kernel tail masking, no padding).
    k3, k4 = jax.random.split(k1)
    B2, T2, V2 = 3, 5, 48
    logits2 = jax.random.normal(k3, (B2, T2, V2), dtype=jnp.float32)
    targets2 = jax.random.randint(k4, (B2, T2), 0, V2, dtype=jnp.int32)
    targets2 = targets2.at[0, -1].set(IGNORE_INDEX)

    loss2, count2 = crit(logits2, targets2)
    loss2 = jax.block_until_ready(loss2)
    ref_loss2, ref_cnt2 = _reference(logits2, targets2)
    assert jnp.allclose(loss2, ref_loss2, atol=1e-5), (loss2, ref_loss2)
    assert jnp.allclose(count2, ref_cnt2), (count2, ref_cnt2)

    # Case 3: bf16 logits (amp path), odd block count (exercises the clamped
    # duplicate-block path) and non-multiple-of-128 vocab.
    crit_amp = CriterionFace(amp=True)
    k5, k6 = jax.random.split(k3)
    B3, T3, V3 = 3, 7, 33
    logits3 = jax.random.normal(k5, (B3, T3, V3), dtype=jnp.float32).astype(jnp.bfloat16)
    targets3 = jax.random.randint(k6, (B3, T3), 0, V3, dtype=jnp.int32)
    targets3 = targets3.at[1, -1].set(IGNORE_INDEX)

    loss3, count3 = crit_amp(logits3, targets3)
    loss3 = jax.block_until_ready(loss3)
    ref_loss3, ref_cnt3 = _reference(logits3, targets3)
    assert jnp.allclose(loss3, ref_loss3, atol=1e-4), (loss3, ref_loss3)
    assert jnp.allclose(count3, ref_cnt3), (count3, ref_cnt3)

    print("KERNEL_OK")
</pallas_src>

<mosaic_0001>
module attributes {stable_mosaic.version = 11 : i64} {
  func.func @kernel(%arg0: i32, %arg1: i32, %arg2: memref<8x1xi32, #tpu.memory_space<vmem>>, %arg3: memref<8x128xf32, #tpu.memory_space<vmem>>, %arg4: memref<8x1xf32, #tpu.memory_space<vmem>>, %arg5: memref<8x1xf32, #tpu.memory_space<vmem>>) attributes {dimension_semantics = [#tpu.dimension_semantics<parallel>, #tpu.dimension_semantics<arbitrary>], iteration_bounds = array<i64: 2, 1>, scalar_prefetch = 0 : i64, scratch_operands = 0 : i64, tpu.core_type = #tpu.core_type<tc>, window_params = [{transform_indices = @transform_0, window_bounds = array<i64: 8, 1>}, {transform_indices = @transform_1, window_bounds = array<i64: 8, 128>}, {transform_indices = @transform_2, window_bounds = array<i64: 8, 1>}, {transform_indices = @transform_3, window_bounds = array<i64: 8, 1>}]} {
    %c0_i32 = arith.constant 0 : i32
    %0 = arith.cmpi eq, %arg1, %c0_i32 : i32
    %1 = arith.extui %0 : i1 to i32
    %c0_i32_0 = arith.constant 0 : i32
    %2 = arith.cmpi ne, %1, %c0_i32_0 : i32
    scf.if %2 {
      %cst_19 = arith.constant 0.000000e+00 : f32
      %49 = vector.broadcast %cst_19 : f32 to vector<8x1xf32>
      %c0_20 = arith.constant 0 : index
      %c0_21 = arith.constant 0 : index
      %50 = vector.load %arg4[%c0_20, %c0_21] : memref<8x1xf32, #tpu.memory_space<vmem>>, vector<8x1xf32>
      tpu.vector_store %arg4[%c0_20, %c0_21], %49 {strides = array<i32>} : memref<8x1xf32, #tpu.memory_space<vmem>>, vector<8x1xf32>,
      %cst_22 = arith.constant 0.000000e+00 : f32
      %51 = vector.broadcast %cst_22 : f32 to vector<8x1xf32>
      %c0_23 = arith.constant 0 : index
      %c0_24 = arith.constant 0 : index
      %52 = vector.load %arg5[%c0_23, %c0_24] : memref<8x1xf32, #tpu.memory_space<vmem>>, vector<8x1xf32>
      tpu.vector_store %arg5[%c0_23, %c0_24], %51 {strides = array<i32>} : memref<8x1xf32, #tpu.memory_space<vmem>>, vector<8x1xf32>,
    } else {
    }
    %c0 = arith.constant 0 : index
    %c0_1 = arith.constant 0 : index
    %3 = vector.load %arg3[%c0, %c0_1] : memref<8x128xf32, #tpu.memory_space<vmem>>, vector<8x128xf32>
    %c0_2 = arith.constant 0 : index
    %c0_3 = arith.constant 0 : index
    %4 = vector.load %arg2[%c0_2, %c0_3] : memref<8x1xi32, #tpu.memory_space<vmem>>, vector<8x1xi32>
    %c1_i32 = arith.constant 1 : i32
    %5 = arith.muli %arg0, %c1_i32 : i32
    %6 = arith.addi %5, %arg1 : i32
    %c8_i32 = arith.constant 8 : i32
    %7 = arith.muli %6, %c8_i32 : i32
    %8 = tpu.iota {dimensions = array<i32: 0>} : vector<8x1xi32>
    %9 = vector.broadcast %7 : i32 to vector<8x1xi32>
    %10 = arith.addi %9, %8 : vector<8x1xi32>
    %c16_i32 = arith.constant 16 : i32
    %11 = vector.broadcast %c16_i32 : i32 to vector<8x1xi32>
    %12 = arith.cmpi slt, %10, %11 : vector<8x1xi32>
    %c0_i32_4 = arith.constant 0 : i32
    %13 = vector.broadcast %c0_i32_4 : i32 to vector<8x1xi32>
    %14 = arith.cmpi sge, %4, %13 : vector<8x1xi32>
    %15 = arith.andi %12, %14 : vector<8x1xi1>
    %cst = arith.constant dense<0xFF800000> : vector<8xf32>
    %16 = vector.multi_reduction <maximumf>, %3, %cst [1] : vector<8x128xf32> to vector<8xf32>
    %17 = vector.shape_cast %16 : vector<8xf32> to vector<8x1xf32>
    %18 = vector.broadcast %17 : vector<8x1xf32> to vector<8x128xf32>
    %19 = arith.subf %3, %18 : vector<8x128xf32>
    %20 = math.exp %19 : vector<8x128xf32>
    %cst_5 = arith.constant dense<0.000000e+00> : vector<8xf32>
    %21 = vector.multi_reduction <add>, %20, %cst_5 [1] : vector<8x128xf32> to vector<8xf32>
    %22 = vector.shape_cast %21 : vector<8xf32> to vector<8x1xf32>
    %23 = math.log %22 : vector<8x1xf32>
    %24 = arith.addf %23, %17 : vector<8x1xf32>
    %25 = tpu.iota {dimensions = array<i32: 1>} : vector<8x128xi32>
    %26 = vector.broadcast %4 : vector<8x1xi32> to vector<8x128xi32>
    %27 = arith.cmpi eq, %25, %26 : vector<8x128xi32>
    %cst_6 = arith.constant 0.903124988 : f32
    %cst_7 = arith.constant 3.125000e-03 : f32
    %28 = vector.broadcast %cst_6 : f32 to vector<8x128xf32>
    %29 = vector.broadcast %cst_7 : f32 to vector<8x128xf32>
    %30 = arith.select %27, %28, %29 : vector<8x128xi1>, vector<8x128xf32>
    %c32_i32 = arith.constant 32 : i32
    %31 = vector.broadcast %c32_i32 : i32 to vector<8x128xi32>
    %32 = arith.cmpi slt, %25, %31 : vector<8x128xi32>
    %cst_8 = arith.constant 0.000000e+00 : f32
    %33 = vector.broadcast %cst_8 : f32 to vector<8x128xf32>
    %34 = arith.select %32, %30, %33 : vector<8x128xi1>, vector<8x128xf32>
    %35 = arith.mulf %34, %3 : vector<8x128xf32>
    %cst_9 = arith.constant dense<0.000000e+00> : vector<8xf32>
    %36 = vector.multi_reduction <add>, %35, %cst_9 [1] : vector<8x128xf32> to vector<8xf32>
    %37 = vector.shape_cast %36 : vector<8xf32> to vector<8x1xf32>
    %38 = arith.subf %24, %37 : vector<8x1xf32>
    %c0_10 = arith.constant 0 : index
    %c0_11 = arith.constant 0 : index
    %39 = vector.load %arg4[%c0_10, %c0_11] : memref<8x1xf32, #tpu.memory_space<vmem>>, vector<8x1xf32>
    %cst_12 = arith.constant 0.000000e+00 : f32
    %40 = vector.broadcast %cst_12 : f32 to vector<8x1xf32>
    %41 = arith.select %15, %38, %40 : vector<8x1xi1>, vector<8x1xf32>
    %42 = arith.addf %39, %41 : vector<8x1xf32>
    %c0_13 = arith.constant 0 : index
    %c0_14 = arith.constant 0 : index
    %43 = vector.load %arg4[%c0_13, %c0_14] : memref<8x1xf32, #tpu.memory_space<vmem>>, vector<8x1xf32>
    tpu.vector_store %arg4[%c0_13, %c0_14], %42 {strides = array<i32>} : memref<8x1xf32, #tpu.memory_space<vmem>>, vector<8x1xf32>,
    %c0_15 = arith.constant 0 : index
    %c0_16 = arith.constant 0 : index
    %44 = vector.load %arg5[%c0_15, %c0_16] : memref<8x1xf32, #tpu.memory_space<vmem>>, vector<8x1xf32>
    %45 = arith.extui %15 : vector<8x1xi1> to vector<8x1xi32>
    %46 = arith.sitofp %45 : vector<8x1xi32> to vector<8x1xf32>
    %47 = arith.addf %44, %46 : vector<8x1xf32>
    %c0_17 = arith.constant 0 : index
    %c0_18 = arith.constant 0 : index
    %48 = vector.load %arg5[%c0_17, %c0_18] : memref<8x1xf32, #tpu.memory_space<vmem>>, vector<8x1xf32>
    tpu.vector_store %arg5[%c0_17, %c0_18], %47 {strides = array<i32>} : memref<8x1xf32, #tpu.memory_space<vmem>>, vector<8x1xf32>,
    return
  }
  func.func @transform_0(%arg0: i32, %arg1: i32) -> (i32, i32) {
    %c1_i32 = arith.constant 1 : i32
    %0 = arith.muli %arg0, %c1_i32 : i32
    %1 = arith.addi %0, %arg1 : i32
    %c1_i32_0 = arith.constant 1 : i32
    %2 = arith.minsi %1, %c1_i32_0 : i32
    %c0_i32 = arith.constant 0 : i32
    %c0_i32_1 = arith.constant 0 : i32
    return %2, %c0_i32 : i32, i32
  }
  func.func @transform_1(%arg0: i32, %arg1: i32) -> (i32, i32) {
    %c1_i32 = arith.constant 1 : i32
    %0 = arith.muli %arg0, %c1_i32 : i32
    %1 = arith.addi %0, %arg1 : i32
    %c1_i32_0 = arith.constant 1 : i32
    %2 = arith.minsi %1, %c1_i32_0 : i32
    %c0_i32 = arith.constant 0 : i32
    %c0_i32_1 = arith.constant 0 : i32
    return %2, %c0_i32 : i32, i32
  }
  func.func @transform_2(%arg0: i32, %arg1: i32) -> (i32, i32) {
    %c0_i32 = arith.constant 0 : i32
    %c0_i32_0 = arith.constant 0 : i32
    return %arg0, %c0_i32 : i32, i32
  }
  func.func @transform_3(%arg0: i32, %arg1: i32) -> (i32, i32) {
    %c0_i32 = arith.constant 0 : i32
    %c0_i32_0 = arith.constant 0 : i32
    return %arg0, %c0_i32 : i32, i32
  }
}

</mosaic_0001>

<bundles_post_ra>
// kernel: tpu_custom_call.1
= control target key start
LH: loop header
LB: loop body
LE: loop exit
PB: predicated region body
PF: predicated region fallthrough
CT: control target
= control target key end

     0   :  { %s501_s12 = smov 0   ;;  %s503_s13 = smov 0   ;;  %s553_s0 = inlined_call_operand.vmem [shape: s32[16,1], index: 0, kind: input, shape index: {}]   ;;  %s554_s1 = inlined_call_operand.vmem [shape: f32[16,128], index: 1, kind: input, shape index: {}]   ;;  %s555_s2 = inlined_call_operand.vmem [shape: f32[16,1], index: 2, kind: output, shape index: {0}]   ;;  %s556_s3 = inlined_call_operand.vmem [shape: f32[16,1], index: 3, kind: output, shape index: {1}]  }
   0x1   :  { %s505_s14 = smov 0  }
   0x2 LB: > { %s26_s15 = sadd.s32 1, %s472_s13  ;;  %p407_p0 = scmp.ge.s32.totalorder %s476_s14, 1  ;;  %s476_s14 = sphi %s505_s14, %s14_s14   ;;  %s472_s13 = sphi %s503_s13, %s558_s13   ;;  %s468_s12 = sphi %s501_s12, %s557_s12  }
   0x3   : > { %p28_p1 = scmp.ge.s32.totalorder %s26_s15, 2  ;;  %p184_p2 = scmp.lt.s32.totalorder %s476_s14, 3 }
   0x5   : > { %s560_s15 = smov (%p28_p1, %s26_s15), 0  ;;  %p185_p3 = pnand %p407_p0, %p184_p2 }
   0x6   : > { %p221_p4 = scmp.lt.s32.totalorder (!%p185_p3), %s468_s12, 1  ;;  %s418_s26 = sshll.u32 (!%p185_p3), %s468_s12, 3 }
   0x7   : > { %188 = sbr.rel (%p185_p3) target bundleno = 281 (0x119), region = 28 }
   0xc   : > { %v478_v0 = vmov 0   ;;  %s523_s16 = scalar_select %p221_p4, %s468_s12, 1  ;;  %v259_v7 = vlaneseq  ;;  %v479_v10 = vmov 0.003125   ;;  %vm252_vm2 = vcmask 7168  }
   0xd   : > { %449 = vset.pattern.permute.xlu0 %v478_v0  ;;  %v261_v15 = vstv %s418_s26  ;;  %v480_v16 = vmov 0.0  }
   0xe   : > { %s224_s17 = scalar_select %p221_p4, %s523_s16, 1  ;;  %v277_v8 = vand.u32 127, %v259_v7  ;;  %v260_v14 = vshrl.u32 %v259_v7, 7 }
   0xf   : > { %s416_s25 = sshll.u32 %s523_s16, 3 }
  0x10   : > { %s411_s18 = sshll.u32 %s224_s17, 3  ;;  %vm283_vm0 = vcmp.lt.s32.totalorder %v277_v8, 32  ;;  %s243_s29 = scalar_lea.vmem %s555_s2, %s416_s25  ;;  %v262_v17 = vadd.s32 %v261_v15, %v260_v14 }
  0x11   : > { %s236_s21 = scalar_lea.vmem %s554_s1, %s411_s18  ;;  %s226_s24 = scalar_lea.vmem %s553_s0, %s411_s18  ;;  %253 = vst.msk [vmem:[%s243_s29] sm:$0xff] %vm252_vm2, %v480_v16 }
  0x12   : > { %v255_v1 = vld [vmem:[%s236_s21] sm:$0xff]  ;;  %s247_s5 = scalar_lea.vmem %s556_s3, %s416_s25  ;;  %vm263_vm4 = vcmp.lt.s32.totalorder %v262_v17, 16 }
  0x13   : > { %266 = vmax.xlane.f32.xlu0 %v255_v1  ;;  %v256_v2 = vld [vmem:[%s226_s24] sm:$0xff]  ;;  %254 = vst.msk [vmem:[%s247_s5] sm:$0xff] %vm252_vm2, %v480_v16 }
  0x14   : > { %vm264_vm3 = vcmp.ge.s32.totalorder %v256_v2, 0 }
  0x15   : > { %vm265_vm5 = vmand %vm263_vm4, %vm264_vm3 }
  0x16   : > { %v419_v18 = vsel %vm265_vm5, 1.0, %v480_v16 }
  0x18   : > { %v289_v26 = vld [vmem:[%s243_s29] sm:$0xff] }
  0x1a   : > { %v294_v19 = vld [vmem:[%s247_s5] sm:$0xff] }
  0x1b   : > { %v297_v20 = vadd.f32 %v419_v18, %v294_v19 }
  0x1d   : > { %298 = vst.msk [vmem:[%s247_s5] sm:$0xff] %vm252_vm2, %v297_v20 }
  0x27   : > { %279 = vperm.xlu0 %449, %v256_v2  }
  0x86   : > { %v267_v3 = vpop.xlane.xlu0 %266 }
  0x87   : > { %v268_v4 = vsub.f32 %v255_v1, %v267_v3 }
  0x89   : > { %v269_v5 = vmul.f32 1.442695, %v268_v4 }
  0x8b   : > { %450 = vpow2.f32 %v269_v5 }
  0x91   : > { %v451_v6 = vpop.eup %450 }
  0x92   : > { %271 = vadd.xlane.f32.xlu1 %v451_v6 }
  0x99   : > { %v280_v9 = vpop.permute.xlu0 %279 }
  0x9a   : > { %vm281_vm1 = vcmp.eq.s32.totalorder %v277_v8, %v280_v9 }
  0x9b   : > { %v282_v11 = vsel %vm281_vm1, 0.903125, %v479_v10 }
  0x9c   : > { %v284_v12 = vsel %vm283_vm0, %v282_v11, 0.0 }
  0x9d   : > { %v285_v13 = vmul.f32 %v284_v12, %v255_v1 }
  0x9f   : > { %286 = vadd.xlane.f32.xlu1 %v285_v13 }
 0x105   : > { %v272_v21 = vpop.xlane.xlu1 %271 }
 0x106   : > { %452 = vlog2.f32 %v272_v21 }
 0x10c   : > { %v453_v22 = vpop.eup %452 }
 0x10d   : > { %v274_v23 = vmul.f32 0.6931472, %v453_v22 }
 0x10f   : > { %v275_v24 = vadd.f32 %v274_v23, %v267_v3 }
 0x112   : > { %v287_v25 = vpop.xlane.xlu1 %286 }
 0x113   : > { %v288_v27 = vsub.f32 %v275_v24, %v287_v25 }
 0x115   : > { %v290_v28 = vsel %vm265_vm5, %v288_v27, 0.0 }
 0x116   : > { %v291_v29 = vadd.f32 %v290_v28, %v289_v26 }
 0x118   : > { %293 = vst.msk [vmem:[%s243_s29] sm:$0xff] %vm252_vm2, %v291_v29 }
 0x119 PF: > { %s14_s14 = sadd.s32 1, %s476_s14   ;;  %s557_s12 = smov %s472_s13 }
 0x11a   : > { %p11_p5 = scmp.ge.s32.totalorder %s14_s14, 4   ;;  %s558_s13 = smov %s560_s15 }
 0x11c   :  { %13 = sbr.rel (!%p11_p5) target bundleno = 2 (0x2), region = 77 }

</bundles_post_ra>
